<compile_context>
chip_gen: v6e
topology: v6e:2x2x1
jax: 0.10.0
libtpu: 0.0.40
codegen_flags: <defaults>
</compile_context>

<pallas_src>
import jax
import jax.numpy as jnp
from jax.experimental import pallas as pl
from jax.experimental.pallas import tpu as pltpu


# VPU-vs-MXU crossover: the op is HBM-bound, so ~2*Cin VALU ops per output vreg stay
# hidden up to Cin ~ 24-32 on v5e/v6e; below that an MXU matmul wastes >95% of the array.
_VPU_MAX_CIN = 24


def _conv1x1_vpu_kernel(x_ref, w_ref, b_ref, o_ref):
    # x_ref: (Cin, TS) lane-dense spatial tile; w_ref: (Ctot, Cin); b_ref: (Ctot, 1);
    # o_ref: (Ctot, TS) lane-dense output tile (Ctot = nstack*Cout).
    cin = x_ref.shape[0]
    w = w_ref[...].astype(jnp.float32)
    # Bias-seeded accumulator: no zeros materialization, no trailing full-slab add.
    acc = jnp.broadcast_to(b_ref[...].astype(jnp.float32), o_ref.shape)
    for ci in range(cin):                        # static unroll over Cin terms
        # Stream each input-channel row straight from the ref (the full (Cin, TS)
        # tile is never held live in vregs); broadcast happens in the FMA.
        x_row = x_ref[pl.ds(ci, 1), :].astype(jnp.float32)        # (1, TS)
        acc = acc + w[:, ci:ci + 1] * x_row                        # (Ctot, TS)
    o_ref[...] = acc.astype(o_ref.dtype)


def _conv1x1_mxu_kernel(x_ref, w_ref, b_ref, o_ref, acc_ref):
    # K-split MXU path: grid axis 2 walks Cin chunks; acc_ref is the resident
    # f32 accumulator (output BlockSpec is invariant along the K axis).
    k = pl.program_id(2)

    @pl.when(k == 0)
    def _():
        acc_ref[...] = jnp.broadcast_to(
            b_ref[...].astype(jnp.float32), acc_ref.shape)

    acc_ref[...] += jax.lax.dot_general(
        w_ref[...], x_ref[...], (((1,), (0,)), ((), ())),
        preferred_element_type=jnp.float32)

    @pl.when(k == pl.num_programs(2) - 1)
    def _():
        o_ref[...] = acc_ref[...].astype(o_ref.dtype)


def _spatial_tiling(s, n, x_rows, out_rows, itemsize, acc_rows=0,
                    vmem_budget_bytes=8 * 1024 * 1024, max_tile=16384):
    """Pick a lane-dense spatial tile (multiple of 128) under a conservative VMEM
    budget (safe on v7x's 64 MiB / 32 MiB scoped VMEM)."""
    # Double-buffered x + out tiles per lane, optional f32 accumulator scratch,
    # plus the (small) double-buffered weight/bias blocks.
    per_lane = (x_rows + out_rows) * itemsize * 2 + acc_rows * 4
    fixed = 2 * (out_rows * x_rows + out_rows) * itemsize
    cap = max(128, min(max_tile,
                       ((vmem_budget_bytes - fixed) // per_lane) // 128 * 128))
    s_aligned = pl.cdiv(s, 128) * 128
    ts = min(s_aligned, cap)
    # v7x has 2 TensorCores: make sure the (parallel) grid has >= 2 steps.
    if n * pl.cdiv(s, ts) < 2 and ts > 128:
        ts = pl.cdiv(pl.cdiv(ts, 2), 128) * 128
    return ts


def _pick_k_chunk(cin, max_tk=256):
    """Cin chunk for the MXU K-split (must keep the (8,128) block constraints)."""
    if cin <= max_tk:
        return cin
    for tk in (256, 128):
        if cin % tk == 0:
            return tk
    # TODO(synk): masked ragged last-K block for large Cin not divisible by 128.
    return cin


@jax.jit
def conv1x1_forward(x_nchw, weight, bias):
    """Fused 1x1 conv with bias, NCHW-native.

    x_nchw: (N, Cin, H, W); weight: (Ctot, Cin); bias: (Ctot,) or (Ctot, 1).
    Returns (N, Ctot, H, W).
    """
    n, cin, h, w = x_nchw.shape
    ctot = weight.shape[0]
    s = h * w
    itemsize = x_nchw.dtype.itemsize

    # Fuse spatial dims: pure reshape of row-major NCHW (free view), spatial axis
    # sits on the TPU lane dimension; no pad / no post-slice HBM passes.
    x_flat = x_nchw.reshape(n, cin, s)
    b_col = bias.reshape(ctot, 1)

    cost = pl.CostEstimate(
        flops=2 * cin * ctot * s * n,
        transcendentals=0,
        bytes_accessed=(cin + ctot) * s * n * itemsize
        + (ctot * cin + ctot) * weight.dtype.itemsize)

    # TODO(synk): if activations are bf16, fold a factor of 2 of the spatial axis
    # into the sublane dim (or keep f32 out) so stores stay fully packed.
    if cin <= _VPU_MAX_CIN:
        # Broadcast-FMA on the VPU: every op runs on a fully populated (Ctot, TS)
        # vreg slab; no MXU padding waste at tiny channel counts.
        ts = _spatial_tiling(s, n, cin, ctot, itemsize)
        out_flat = pl.pallas_call(
            _conv1x1_vpu_kernel,
            out_shape=jax.ShapeDtypeStruct((n, ctot, s), x_nchw.dtype),
            grid_spec=pltpu.PrefetchScalarGridSpec(
                num_scalar_prefetch=0,
                grid=(n, pl.cdiv(s, ts)),
                in_specs=[
                    pl.BlockSpec((None, cin, ts), lambda i, j: (i, 0, j)),
                    pl.BlockSpec((ctot, cin), lambda i, j: (0, 0)),
                    pl.BlockSpec((ctot, 1), lambda i, j: (0, 0)),
                ],
                out_specs=pl.BlockSpec((None, ctot, ts), lambda i, j: (i, 0, j)),
            ),
            compiler_params=pltpu.CompilerParams(
                dimension_semantics=("parallel", "parallel")),
            cost_estimate=cost,
        )(x_flat, weight, b_col)
    else:
        # MXU path with K-split: f32 VMEM accumulator, reduction axis last.
        tk = _pick_k_chunk(cin)
        ts = _spatial_tiling(s, n, tk, ctot, itemsize, acc_rows=ctot)
        out_flat = pl.pallas_call(
            _conv1x1_mxu_kernel,
            out_shape=jax.ShapeDtypeStruct((n, ctot, s), x_nchw.dtype),
            grid_spec=pltpu.PrefetchScalarGridSpec(
                num_scalar_prefetch=0,
                grid=(n, pl.cdiv(s, ts), cin // tk),
                in_specs=[
                    pl.BlockSpec((None, tk, ts), lambda i, j, k: (i, k, j)),
                    pl.BlockSpec((ctot, tk), lambda i, j, k: (0, k)),
                    pl.BlockSpec((ctot, 1), lambda i, j, k: (0, 0)),
                ],
                out_specs=pl.BlockSpec((None, ctot, ts),
                                       lambda i, j, k: (i, 0, j)),
                scratch_shapes=[pltpu.VMEM((ctot, ts), jnp.float32)],
            ),
            compiler_params=pltpu.CompilerParams(
                dimension_semantics=("parallel", "parallel", "arbitrary")),
            cost_estimate=cost,
        )(x_flat, weight, b_col)

    return out_flat.reshape(n, ctot, h, w)


def resunet_heads_forward(x_nchw, weights, biases):
    """All nstack `outs[i]` prediction heads in ONE Pallas call (x read once)."""
    nstack = len(weights)
    cout = weights[0].shape[0]
    w_all = jnp.concatenate([w.reshape(cout, -1) for w in weights], axis=0)
    b_all = jnp.concatenate(biases, axis=0)
    out = conv1x1_forward(x_nchw, w_all, b_all)          # (N, nstack*Cout, H, W)
    return [out[:, i * cout:(i + 1) * cout] for i in range(nstack)]


if __name__ == "__main__":
    # Shapes consistent with the module: nstack=2, inp_dim=4, oup_dim=8, 16x16 maps.
    nstack, batch, inp_dim, oup_dim, spatial = 2, 2, 4, 8, 16

    key = jax.random.PRNGKey(0)
    kx, *kws = jax.random.split(key, 1 + 2 * nstack)
    x = jax.random.normal(kx, (batch, inp_dim, spatial, spatial), dtype=jnp.float32)

    # TODO(synk): Hourglass / Residual / the bn+relu feature conv of ResUnetBlock are
    # external modules not provided in the spec; the fused 1x1 heads are applied to
    # the input feature map directly.
    weights, biases = [], []
    for i in range(nstack):
        weights.append(
            jax.random.normal(kws[2 * i], (oup_dim, inp_dim), jnp.float32) * 0.1)
        biases.append(
            jax.random.normal(kws[2 * i + 1], (oup_dim,), jnp.float32) * 0.1)

    combined_hm_preds = resunet_heads_forward(x, weights, biases)
    jax.block_until_ready(combined_hm_preds)

    for i in range(nstack):
        ref = jnp.einsum("nchw,oc->nohw", x, weights[i]) \
            + biases[i][None, :, None, None]
        assert combined_hm_preds[i].shape == (batch, oup_dim, spatial, spatial)
        assert jnp.allclose(combined_hm_preds[i], ref, atol=1e-5, rtol=1e-5)

    # Secondary sanity check of the MXU / K-split path (large Cin -> 2 K chunks).
    kx2, kw2, kb2 = jax.random.split(jax.random.PRNGKey(1), 3)
    cin_big = 512
    x2 = jax.random.normal(kx2, (1, cin_big, spatial, spatial), jnp.float32)
    w2 = jax.random.normal(kw2, (oup_dim, cin_big), jnp.float32) * 0.05
    b2 = jax.random.normal(kb2, (oup_dim,), jnp.float32) * 0.05
    y2 = conv1x1_forward(x2, w2, b2)
    jax.block_until_ready(y2)
    ref2 = jnp.einsum("nchw,oc->nohw", x2, w2,
                      precision=jax.lax.Precision.HIGHEST) \
        + b2[None, :, None, None]
    assert y2.shape == (1, oup_dim, spatial, spatial)
    assert jnp.allclose(y2, ref2, atol=1e-2, rtol=1e-2)

    print("KERNEL_OK")
</pallas_src>

<mosaic_0001>
module attributes {stable_mosaic.version = 11 : i64} {
  func.func @_conv1x1_vpu_kernel(%arg0: i32, %arg1: i32, %arg2: memref<1x4x256xf32, #tpu.memory_space<vmem>>, %arg3: memref<16x4xf32, #tpu.memory_space<vmem>>, %arg4: memref<16x1xf32, #tpu.memory_space<vmem>>, %arg5: memref<1x16x256xf32, #tpu.memory_space<vmem>>) attributes {dimension_semantics = [#tpu.dimension_semantics<parallel>, #tpu.dimension_semantics<parallel>], iteration_bounds = array<i64: 2, 1>, scalar_prefetch = 0 : i64, scratch_operands = 0 : i64, tpu.core_type = #tpu.core_type<tc>, window_params = [{transform_indices = @transform_0, window_bounds = array<i64: 1, 4, 256>}, {pipeline_mode = #tpu.pipeline_mode<synchronous>, transform_indices = @transform_1, window_bounds = array<i64: 16, 4>}, {pipeline_mode = #tpu.pipeline_mode<synchronous>, transform_indices = @transform_2, window_bounds = array<i64: 16, 1>}, {transform_indices = @transform_3, window_bounds = array<i64: 1, 16, 256>}]} {
    %c0 = arith.constant 0 : index
    %c0_0 = arith.constant 0 : index
    %0 = vector.load %arg3[%c0, %c0_0] : memref<16x4xf32, #tpu.memory_space<vmem>>, vector<16x4xf32>
    %c0_1 = arith.constant 0 : index
    %c0_2 = arith.constant 0 : index
    %1 = vector.load %arg4[%c0_1, %c0_2] : memref<16x1xf32, #tpu.memory_space<vmem>>, vector<16x1xf32>
    %2 = vector.shape_cast %1 : vector<16x1xf32> to vector<16x1xf32>
    %3 = vector.broadcast %2 : vector<16x1xf32> to vector<16x256xf32>
    %c0_3 = arith.constant 0 : index
    %c0_4 = arith.constant 0 : index
    %c0_5 = arith.constant 0 : index
    %4 = vector.load %arg2[%c0_3, %c0_4, %c0_5] : memref<1x4x256xf32, #tpu.memory_space<vmem>>, vector<1x1x256xf32>
    %5 = vector.shape_cast %4 : vector<1x1x256xf32> to vector<1x256xf32>
    %6 = vector.extract_strided_slice %0 {offsets = [0, 0], sizes = [16, 1], strides = [1, 1]} : vector<16x4xf32> to vector<16x1xf32>
    %7 = vector.broadcast %6 : vector<16x1xf32> to vector<16x256xf32>
    %8 = vector.broadcast %5 : vector<1x256xf32> to vector<16x256xf32>
    %9 = arith.mulf %7, %8 : vector<16x256xf32>
    %10 = arith.addf %3, %9 : vector<16x256xf32>
    %c0_6 = arith.constant 0 : index
    %c1 = arith.constant 1 : index
    %c0_7 = arith.constant 0 : index
    %11 = vector.load %arg2[%c0_6, %c1, %c0_7] : memref<1x4x256xf32, #tpu.memory_space<vmem>>, vector<1x1x256xf32>
    %12 = vector.shape_cast %11 : vector<1x1x256xf32> to vector<1x256xf32>
    %13 = vector.extract_strided_slice %0 {offsets = [0, 1], sizes = [16, 1], strides = [1, 1]} : vector<16x4xf32> to vector<16x1xf32>
    %14 = vector.broadcast %13 : vector<16x1xf32> to vector<16x256xf32>
    %15 = vector.broadcast %12 : vector<1x256xf32> to vector<16x256xf32>
    %16 = arith.mulf %14, %15 : vector<16x256xf32>
    %17 = arith.addf %10, %16 : vector<16x256xf32>
    %c0_8 = arith.constant 0 : index
    %c2 = arith.constant 2 : index
    %c0_9 = arith.constant 0 : index
    %18 = vector.load %arg2[%c0_8, %c2, %c0_9] : memref<1x4x256xf32, #tpu.memory_space<vmem>>, vector<1x1x256xf32>
    %19 = vector.shape_cast %18 : vector<1x1x256xf32> to vector<1x256xf32>
    %20 = vector.extract_strided_slice %0 {offsets = [0, 2], sizes = [16, 1], strides = [1, 1]} : vector<16x4xf32> to vector<16x1xf32>
    %21 = vector.broadcast %20 : vector<16x1xf32> to vector<16x256xf32>
    %22 = vector.broadcast %19 : vector<1x256xf32> to vector<16x256xf32>
    %23 = arith.mulf %21, %22 : vector<16x256xf32>
    %24 = arith.addf %17, %23 : vector<16x256xf32>
    %c0_10 = arith.constant 0 : index
    %c3 = arith.constant 3 : index
    %c0_11 = arith.constant 0 : index
    %25 = vector.load %arg2[%c0_10, %c3, %c0_11] : memref<1x4x256xf32, #tpu.memory_space<vmem>>, vector<1x1x256xf32>
    %26 = vector.shape_cast %25 : vector<1x1x256xf32> to vector<1x256xf32>
    %27 = vector.extract_strided_slice %0 {offsets = [0, 3], sizes = [16, 1], strides = [1, 1]} : vector<16x4xf32> to vector<16x1xf32>
    %28 = vector.broadcast %27 : vector<16x1xf32> to vector<16x256xf32>
    %29 = vector.broadcast %26 : vector<1x256xf32> to vector<16x256xf32>
    %30 = arith.mulf %28, %29 : vector<16x256xf32>
    %31 = arith.addf %24, %30 : vector<16x256xf32>
    %c0_12 = arith.constant 0 : index
    %c0_13 = arith.constant 0 : index
    %c0_14 = arith.constant 0 : index
    %32 = vector.load %arg5[%c0_12, %c0_13, %c0_14] : memref<1x16x256xf32, #tpu.memory_space<vmem>>, vector<1x16x256xf32>
    %33 = vector.shape_cast %32 : vector<1x16x256xf32> to vector<16x256xf32>
    %34 = vector.shape_cast %31 : vector<16x256xf32> to vector<1x16x256xf32>
    tpu.vector_store %arg5[%c0_12, %c0_13, %c0_14], %34 {strides = array<i32>} : memref<1x16x256xf32, #tpu.memory_space<vmem>>, vector<1x16x256xf32>,
    return
  }
  func.func @transform_0(%arg0: i32, %arg1: i32) -> (i32, i32, i32) {
    %c0_i32 = arith.constant 0 : i32
    %c0_i32_0 = arith.constant 0 : i32
    return %arg0, %c0_i32, %arg1 : i32, i32, i32
  }
  func.func @transform_1(%arg0: i32, %arg1: i32) -> (i32, i32) {
    %c0_i32 = arith.constant 0 : i32
    %c0_i32_0 = arith.constant 0 : i32
    %c0_i32_1 = arith.constant 0 : i32
    return %c0_i32, %c0_i32_0 : i32, i32
  }
  func.func @transform_2(%arg0: i32, %arg1: i32) -> (i32, i32) {
    %c0_i32 = arith.constant 0 : i32
    %c0_i32_0 = arith.constant 0 : i32
    %c0_i32_1 = arith.constant 0 : i32
    return %c0_i32, %c0_i32_0 : i32, i32
  }
  func.func @transform_3(%arg0: i32, %arg1: i32) -> (i32, i32, i32) {
    %c0_i32 = arith.constant 0 : i32
    %c0_i32_0 = arith.constant 0 : i32
    return %arg0, %c0_i32, %arg1 : i32, i32, i32
  }
}

</mosaic_0001>

<bundles_post_ra>
// kernel: conv1x1_forward.1
= control target key start
LH: loop header
LB: loop body
LE: loop exit
PB: predicated region body
PF: predicated region fallthrough
CT: control target
= control target key end

     0   :  { %s532_s12 = smov 0   ;;  %s534_s13 = smov 0   ;;  %s585_s0 = inlined_call_operand.vmem [shape: f32[2,4,256], index: 0, kind: input, shape index: {}]   ;;  %s586_s1 = inlined_call_operand.vmem [shape: f32[16,4], index: 1, kind: input, shape index: {}]   ;;  %s587_s2 = inlined_call_operand.vmem [shape: f32[16,1], index: 2, kind: input, shape index: {}]   ;;  %s588_s3 = inlined_call_operand.vmem [shape: f32[2,16,256], index: 3, kind: output, shape index: {}]  }
   0x1   :  { %s536_s14 = smov 0  }
   0x2 LB: > { %s25_s15 = sadd.s32 1, %s502_s13  ;;  %p436_p0 = scmp.ge.s32.totalorder %s506_s14, 1  ;;  %s506_s14 = sphi %s536_s14, %s13_s14   ;;  %s502_s13 = sphi %s534_s13, %s590_s13   ;;  %s498_s12 = sphi %s532_s12, %s589_s12  }
   0x3   : > { %p27_p1 = scmp.ge.s32.totalorder %s25_s15, 2  ;;  %p158_p2 = scmp.lt.s32.totalorder %s506_s14, 3 }
   0x5   : > { %s592_s15 = smov (%p27_p1, %s25_s15), 0  ;;  %p159_p3 = pnand %p436_p0, %p158_p2 }
   0x6   : > { %p191_p4 = scmp.lt.s32.totalorder (!%p159_p3), %s498_s12, 1 }
   0x7   : > { %162 = sbr.rel (%p159_p3) target bundleno = 166 (0xa6), region = 32 }
   0xc   : > { %v212_v0 = vld [vmem:[%s587_s2] sm:$0xff]  ;;  %v508_v2 = vmov 0   ;;  %v213_v3 = vld [vmem:[%s587_s2 + $0x8] sm:$0xff]  ;;  %v509_v5 = vmov 1   ;;  %v510_v6 = vmov 2   ;;  %v511_v7 = vmov 3  }
   0xd   : > { %v210_v1 = vld [vmem:[%s586_s1] sm:$0xff]  ;;  %477 = vset.pattern.permute.xlu1 %v508_v2  ;;  %476 = vset.pattern.permute.xlu0 %v508_v2  ;;  %v211_v4 = vld [vmem:[%s586_s1 + $0x8] sm:$0xff]  ;;  %s594_s12 = smov (!%p191_p4, %s498_s12), 1  ;;  %v236_v8 = vlaneseq }
   0xe   : > { %216 = vperm.xlu1 %477, %v212_v0   ;;  %227 = vperm.xlu0 %476, %v210_v1   ;;  %s446_s24 = sshll.u32 %s594_s12, 3  ;;  %s447_s28 = sshll.u32 %s594_s12, 5 }
   0xf   : > { %v237_v10 = vshrl.u32 %v236_v8, 7  ;;  %s198_s27 = scalar_lea.vmem %s585_s0, %s446_s24  ;;  %s208_s4 = scalar_lea.vmem %s588_s3, %s447_s28 }
  0x10   : > { %v224_v16 = vld [vmem:[%s198_s27] ss:$4 sm:$0x3]  ;;  %v441_v17 = vld [vmem:[%s198_s27 + $0x1] ss:$4 sm:$0x3] }
  0x11   : > { %v238_v12 = vsub.s32 0, %v237_v10  ;;  %v242_v13 = vsub.s32 1, %v237_v10  ;;  %v442_v21 = vld [vmem:[%s198_s27 + $0x2] ss:$4 sm:$0x3] }
  0x12   : > { %221 = vperm.xlu1 %477, %v213_v3   ;;  %232 = vperm.xlu0 %476, %v211_v4   ;;  %v443_v29 = vld [vmem:[%s198_s27 + $0x3] ss:$4 sm:$0x3] }
  0x13   : > { %v239_v18 = vrot.slane %v224_v16, %v238_v12  ;;  %v243_v19 = vrot.slane %v224_v16, %v242_v13  ;;  %v268_v22 = vrot.slane %v441_v17, %v238_v12  ;;  %v272_v23 = vrot.slane %v441_v17, %v242_v13 }
  0x14   : > { %v297_v27 = vrot.slane %v442_v21, %v238_v12  ;;  %v301_v28 = vrot.slane %v442_v21, %v242_v13  ;;  %v326_v35 = vrot.slane %v443_v29, %v238_v12  ;;  %v330_v36 = vrot.slane %v443_v29, %v242_v13 }
  0x16   : > { %479 = vset.pattern.permute.xlu1 %v509_v5  ;;  %478 = vset.pattern.permute.xlu0 %v509_v5 }
  0x17   : > { %261 = vperm.xlu1 %479, %v211_v4   ;;  %257 = vperm.xlu0 %478, %v210_v1  }
  0x1b   : > { %480 = vset.pattern.permute.xlu1 %v510_v6  ;;  %481 = vset.pattern.permute.xlu0 %v510_v6 }
  0x1c   : > { %286 = vperm.xlu1 %480, %v210_v1   ;;  %290 = vperm.xlu0 %481, %v211_v4  }
  0x20   : > { %482 = vset.pattern.permute.xlu1 %v511_v7  ;;  %483 = vset.pattern.permute.xlu0 %v511_v7 }
  0x21   : > { %315 = vperm.xlu1 %482, %v210_v1  }
  0x25   : > { %319 = vperm.xlu1 %482, %v211_v4  }
  0x89   : > { %v217_v9 = vpop.permute.xlu1 %216  ;;  %v228_v11 = vpop.permute.xlu0 %227 }
  0x8a   : > { %v246_v25 = vmul.f32 %v239_v18, %v228_v11  ;;  %v247_v26 = vmul.f32 %v243_v19, %v228_v11 }
  0x8c   : > { %v250_v37 = vadd.f32 %v246_v25, %v217_v9  ;;  %v251_v38 = vadd.f32 %v247_v26, %v217_v9 }
  0x8d   : > { %v222_v14 = vpop.permute.xlu1 %221  ;;  %v233_v15 = vpop.permute.xlu0 %232 }
  0x8e   : > { %v248_v33 = vmul.f32 %v239_v18, %v233_v15  ;;  %v249_v34 = vmul.f32 %v243_v19, %v233_v15 }
  0x90   : > { %v252_v46 = vadd.f32 %v248_v33, %v222_v14  ;;  %v253_v47 = vadd.f32 %v249_v34, %v222_v14 }
  0x92   : > { %v262_v20 = vpop.permute.xlu1 %261  ;;  %v258_v24 = vpop.permute.xlu0 %257 }
  0x93   : > { %v275_v30 = vmul.f32 %v268_v22, %v258_v24  ;;  %v276_v31 = vmul.f32 %v272_v23, %v258_v24  ;;  %v277_v42 = vmul.f32 %v268_v22, %v262_v20  ;;  %v278_v43 = vmul.f32 %v272_v23, %v262_v20 }
  0x95   : > { %v279_v44 = vadd.f32 %v275_v30, %v250_v37  ;;  %v280_v45 = vadd.f32 %v276_v31, %v251_v38  ;;  %v281_v55 = vadd.f32 %v277_v42, %v252_v46  ;;  %v282_v56 = vadd.f32 %v278_v43, %v253_v47 }
  0x97   : > { %v287_v32 = vpop.permute.xlu1 %286  ;;  %v291_v41 = vpop.permute.xlu0 %290 }
  0x98   : > { %v304_v39 = vmul.f32 %v297_v27, %v287_v32  ;;  %v305_v40 = vmul.f32 %v301_v28, %v287_v32  ;;  %v306_v48 = vmul.f32 %v297_v27, %v291_v41  ;;  %v307_v49 = vmul.f32 %v301_v28, %v291_v41 }
  0x9a   : > { %v308_v51 = vadd.f32 %v304_v39, %v279_v44  ;;  %v309_v52 = vadd.f32 %v305_v40, %v280_v45  ;;  %v310_v60 = vadd.f32 %v306_v48, %v281_v55  ;;  %v311_v61 = vadd.f32 %v307_v49, %v282_v56 }
  0x9c   : > { %v316_v50 = vpop.permute.xlu1 %315 }
  0x9d   : > { %v333_v53 = vmul.f32 %v326_v35, %v316_v50  ;;  %v334_v54 = vmul.f32 %v330_v36, %v316_v50 }
  0x9f   : > { %v337_v57 = vadd.f32 %v333_v53, %v308_v51  ;;  %v338_v58 = vadd.f32 %v334_v54, %v309_v52 }
  0xa0   : > { %v320_v59 = vpop.permute.xlu1 %319 }
  0xa1   : > { %341 = vst [vmem:[%s208_s4] sm:$0xff] %v337_v57  ;;  %342 = vst [vmem:[%s208_s4 + $0x8] sm:$0xff] %v338_v58  ;;  %v335_v62 = vmul.f32 %v326_v35, %v320_v59  ;;  %v336_v63 = vmul.f32 %v330_v36, %v320_v59 }
  0xa3   : > { %v339_v0 = vadd.f32 %v335_v62, %v310_v60  ;;  %v340_v1 = vadd.f32 %v336_v63, %v311_v61 }
  0xa5   : > { %343 = vst [vmem:[%s208_s4 + $0x10] sm:$0xff] %v339_v0  ;;  %344 = vst [vmem:[%s208_s4 + $0x18] sm:$0xff] %v340_v1 }
  0xa6 PF: > { %s13_s14 = sadd.s32 1, %s506_s14   ;;  %s589_s12 = smov %s502_s13 }
  0xa7   : > { %p10_p5 = scmp.ge.s32.totalorder %s13_s14, 4   ;;  %s590_s13 = smov %s592_s15 }
  0xa9   :  { %12 = sbr.rel (!%p10_p5) target bundleno = 2 (0x2), region = 65 }

</bundles_post_ra>
